<compile_context>
chip_gen: v7x
topology: tpu7x:2x2x1
jax: 0.10.0
libtpu: 0.0.40
codegen_flags: <defaults>
</compile_context>

<pallas_src>
import functools
import math

import jax
import jax.numpy as jnp
from jax.experimental import pallas as pl
from jax.experimental.pallas import tpu as pltpu


# --------------------------------------------------------------------------- #
# helpers
# --------------------------------------------------------------------------- #
def _f32(x):
    # only cast when needed (no extra copy for f32 inputs)
    return x if x.dtype == jnp.float32 else x.astype(jnp.float32)


_VMEM_TARGET = 30 * 1024 * 1024   # per-kernel activation+weight budget, safe on v5e/v6e/v7x


def _row_tile(rows: int, fixed_bytes: int, per_row_bytes: int) -> int:
    """Largest MXU/sublane-aligned row tile whose VMEM footprint fits the budget.

    fixed_bytes   : VMEM that does not scale with the row tile (double-buffered weight
                    blocks, biases, LN params).
    per_row_bytes : bytes per activation row (double-buffered in/out tiles + f32
                    intermediates held live inside the kernel).
    Also keeps >= ~4 grid steps when possible so a "parallel" 1-D grid can be
    sharded across v7x's two TensorCores.
    """
    if rows <= 8:
        return rows                                   # full-extent block is layout-legal
    budget = max(_VMEM_TARGET - fixed_bytes, 8 * per_row_bytes)
    t = budget // per_row_bytes
    t = min(t, rows, 2048)
    t = min(t, max(8, -(-rows // 4)))                 # >= ~4 steps for megacore sharding
    align = 256 if t >= 256 else 8                    # 256x256 MXU tiles on v6e/v7x
    return max(8, int(t // align) * align)


def _vmem_limit(bytes_needed: int) -> int:
    # Never lower the per-generation scoped default (16/32 MiB); never ask for more
    # than v7x's 64 MiB physical VMEM can reasonably grant.
    return int(min(max(bytes_needed + bytes_needed // 2, 32 << 20), 48 << 20))


# --------------------------------------------------------------------------- #
# kernel: fused attention sub-block (one batch element per grid step)
#   [x += pos_emb]  ->  LN1  ->  QKV  ->  causal MHA  ->  out-proj  ->  + residual
# --------------------------------------------------------------------------- #
def _attn_block_kernel(x_ref, *rest, n_heads, eps, has_pos):
    if has_pos:
        pe_ref, g_ref, b_ref, wqkv_ref, bqkv_ref, wo_ref, bo_ref, o_ref = rest
    else:
        g_ref, b_ref, wqkv_ref, bqkv_ref, wo_ref, bo_ref, o_ref = rest

    x_in = x_ref[...]                                   # (L, D), native dtype
    cdt = x_in.dtype                                    # MXU operand dtype (bf16/fp16/f32)
    x32 = _f32(x_in)
    if has_pos:
        x32 = x32 + _f32(pe_ref[...])                   # fused positional-embedding add

    # pre-LN (ln_1): statistics in f32, rsqrt on the EUP
    mu = jnp.mean(x32, axis=-1, keepdims=True)
    xc = x32 - mu
    var = jnp.mean(xc * xc, axis=-1, keepdims=True)
    h = (xc * jax.lax.rsqrt(var + eps) * _f32(g_ref[...]) + _f32(b_ref[...])).astype(cdt)

    # fused QKV projection (q columns were pre-scaled by 1/sqrt(dh) in prepare_params)
    qkv = jnp.dot(h, wqkv_ref[...], preferred_element_type=jnp.float32) + _f32(bqkv_ref[...])
    L, D = x_in.shape
    dh = D // n_heads
    q = qkv[:, :D].astype(cdt)
    k = qkv[:, D:2 * D].astype(cdt)
    v = qkv[:, 2 * D:].astype(cdt)

    row = jax.lax.broadcasted_iota(jnp.int32, (L, L), 0)
    col = jax.lax.broadcasted_iota(jnp.int32, (L, L), 1)
    causal = col <= row
    neg = jnp.float32(-1e30)

    # residual + out-proj bias; each head is contracted with its w_o row-slice and
    # accumulated immediately (no concat, no long per-head liveness).
    acc = x32 + _f32(bo_ref[...])
    for hd in range(n_heads):
        lo, hi = hd * dh, (hd + 1) * dh
        s = jax.lax.dot_general(q[:, lo:hi], k[:, lo:hi], (((1,), (1,)), ((), ())),
                                preferred_element_type=jnp.float32)          # (L, L)
        s = jnp.where(causal, s, neg)
        mrow = jnp.max(s, axis=-1, keepdims=True)
        p = jnp.exp(s - mrow)
        inv = pl.reciprocal(jnp.sum(p, axis=-1, keepdims=True), approx=True)  # EUP
        pv = jnp.dot(p.astype(cdt), v[:, lo:hi], preferred_element_type=jnp.float32)
        av = (pv * inv).astype(cdt)                                           # (L, dh)
        acc = acc + jnp.dot(av, wo_ref[lo:hi, :], preferred_element_type=jnp.float32)
    o_ref[...] = acc.astype(o_ref.dtype)


def attention_block(x, pe, ln_g, ln_b, w_qkv, b_qkv, w_o, b_o, n_heads, eps=1e-5):
    B, L, D = x.shape
    has_pos = pe is not None
    itemsize = jnp.dtype(x.dtype).itemsize

    vec = lambda n: pl.BlockSpec((1, n), lambda bb: (0, 0))
    in_specs = [pl.BlockSpec((None, L, D), lambda bb: (bb, 0, 0))]
    args = [x]
    if has_pos:
        in_specs.append(pl.BlockSpec((L, D), lambda bb: (0, 0)))
        args.append(pe)
    in_specs += [vec(D), vec(D),
                 pl.BlockSpec((D, 3 * D), lambda bb: (0, 0)), vec(3 * D),
                 pl.BlockSpec((D, D), lambda bb: (0, 0)), vec(D)]
    args += [ln_g.reshape(1, D), ln_b.reshape(1, D),
             w_qkv, b_qkv.reshape(1, 3 * D), w_o, b_o.reshape(1, D)]

    # honest VMEM estimate: double-buffered weights + double-buffered in/out batch
    # blocks + f32 intermediates (qkv, acc, scores)
    fixed = 2 * itemsize * (D * 3 * D + D * D) + itemsize * (8 * D + L * D)
    per_b = 2 * 2 * L * D * itemsize + 4 * (L * 3 * D + L * D + 3 * L * L)
    need = fixed + per_b

    return pl.pallas_call(
        functools.partial(_attn_block_kernel, n_heads=n_heads, eps=eps, has_pos=has_pos),
        out_shape=jax.ShapeDtypeStruct((B, L, D), x.dtype),
        grid_spec=pltpu.PrefetchScalarGridSpec(
            num_scalar_prefetch=0,
            grid=(B,),
            in_specs=in_specs,
            out_specs=pl.BlockSpec((None, L, D), lambda bb: (bb, 0, 0))),
        compiler_params=pltpu.CompilerParams(
            dimension_semantics=("parallel",),
            vmem_limit_bytes=_vmem_limit(need)),
    )(*args)


# --------------------------------------------------------------------------- #
# kernel: fused MLP sub-block over MXU-aligned row tiles of the (B*L, D) view
#   LN2 -> fc -> QuickGELU -> proj -> + residual
# --------------------------------------------------------------------------- #
def _mlp_block_kernel(x_ref, g_ref, b_ref, wfc_ref, bfc_ref, wpr_ref, bpr_ref, o_ref, *, eps):
    x_in = x_ref[...]                                    # (tr, D)
    cdt = x_in.dtype
    x32 = _f32(x_in)
    mu = jnp.mean(x32, axis=-1, keepdims=True)
    xc = x32 - mu
    var = jnp.mean(xc * xc, axis=-1, keepdims=True)
    h = (xc * jax.lax.rsqrt(var + eps) * _f32(g_ref[...]) + _f32(b_ref[...])).astype(cdt)
    m = jnp.dot(h, wfc_ref[...], preferred_element_type=jnp.float32) + _f32(bfc_ref[...])
    m = m * jax.nn.sigmoid(1.702 * m)                    # QuickGELU (sigmoid -> EUP)
    y = jnp.dot(m.astype(cdt), wpr_ref[...], preferred_element_type=jnp.float32)
    o_ref[...] = (x32 + y + _f32(bpr_ref[...])).astype(o_ref.dtype)


def mlp_block(x2, ln_g, ln_b, w_fc, b_fc, w_proj, b_proj, eps=1e-5):
    rows, D = x2.shape
    d_mlp = w_fc.shape[1]
    itemsize = jnp.dtype(x2.dtype).itemsize

    fixed = 2 * itemsize * (D * d_mlp + d_mlp * D) + itemsize * (4 * D + 2 * d_mlp)
    per_row = 2 * 2 * D * itemsize + 4 * (d_mlp + 2 * D)       # in/out (x2 bufs) + f32 m / x32
    tr = _row_tile(rows, fixed, per_row)
    need = fixed + tr * per_row

    vec = lambda n: pl.BlockSpec((1, n), lambda i: (0, 0))
    return pl.pallas_call(
        functools.partial(_mlp_block_kernel, eps=eps),
        out_shape=jax.ShapeDtypeStruct((rows, D), x2.dtype),
        grid_spec=pltpu.PrefetchScalarGridSpec(
            num_scalar_prefetch=0,
            grid=(pl.cdiv(rows, tr),),
            in_specs=[pl.BlockSpec((tr, D), lambda i: (i, 0)),
                      vec(D), vec(D),
                      pl.BlockSpec((D, d_mlp), lambda i: (0, 0)), vec(d_mlp),
                      pl.BlockSpec((d_mlp, D), lambda i: (0, 0)), vec(D)],
            out_specs=pl.BlockSpec((tr, D), lambda i: (i, 0))),
        compiler_params=pltpu.CompilerParams(
            dimension_semantics=("parallel",),
            vmem_limit_bytes=_vmem_limit(need)),
    )(x2, ln_g.reshape(1, D), ln_b.reshape(1, D),
      w_fc, b_fc.reshape(1, d_mlp), w_proj, b_proj.reshape(1, D))


# --------------------------------------------------------------------------- #
# kernel: fused LN_final + text projection on the already-gathered EOT rows
# --------------------------------------------------------------------------- #
def _final_project_kernel(x_ref, g_ref, b_ref, w_ref, o_ref, *, eps):
    x_in = x_ref[...]                                    # (tr, D)
    cdt = x_in.dtype
    x32 = _f32(x_in)
    mu = jnp.mean(x32, axis=-1, keepdims=True)
    xc = x32 - mu
    var = jnp.mean(xc * xc, axis=-1, keepdims=True)
    h = (xc * jax.lax.rsqrt(var + eps) * _f32(g_ref[...]) + _f32(b_ref[...])).astype(cdt)
    o_ref[...] = jnp.dot(h, w_ref[...], preferred_element_type=jnp.float32).astype(o_ref.dtype)


def final_projection(x_eot, ln_g, ln_b, w_proj, eps=1e-5):
    B, D = x_eot.shape
    P = w_proj.shape[1]
    itemsize = jnp.dtype(x_eot.dtype).itemsize
    fixed = 2 * itemsize * D * P + itemsize * 4 * D
    per_row = 2 * itemsize * (D + P) + 4 * D
    tr = _row_tile(B, fixed, per_row)
    need = fixed + tr * per_row
    vec = lambda n: pl.BlockSpec((1, n), lambda i: (0, 0))
    return pl.pallas_call(
        functools.partial(_final_project_kernel, eps=eps),
        out_shape=jax.ShapeDtypeStruct((B, P), x_eot.dtype),
        grid_spec=pltpu.PrefetchScalarGridSpec(
            num_scalar_prefetch=0,
            grid=(pl.cdiv(B, tr),),
            in_specs=[pl.BlockSpec((tr, D), lambda i: (i, 0)),
                      vec(D), vec(D),
                      pl.BlockSpec((D, P), lambda i: (0, 0))],
            out_specs=pl.BlockSpec((tr, P), lambda i: (i, 0))),
        compiler_params=pltpu.CompilerParams(
            dimension_semantics=("parallel",),
            vmem_limit_bytes=_vmem_limit(need)),
    )(x_eot, ln_g.reshape(1, D), ln_b.reshape(1, D), w_proj)


# --------------------------------------------------------------------------- #
# parameter prep + full TextEncoder forward
# --------------------------------------------------------------------------- #
def prepare_params(params, n_heads, dtype=None):
    """One-time (checkpoint-load time) parameter prep:
      * fold the 1/sqrt(dh) attention scale into the q projection weights/bias,
      * optionally cast every parameter to the compute dtype (bf16/fp16 feeds the
        MXU at full rate; None keeps f32).
    """
    D = params["positional_embedding"].shape[-1]
    scale = 1.0 / math.sqrt(D // n_heads)
    cast = (lambda a: a) if dtype is None else (lambda a: a.astype(dtype))
    out = {
        "positional_embedding": cast(params["positional_embedding"]),
        "lnf_g": cast(params["lnf_g"]),
        "lnf_b": cast(params["lnf_b"]),
        "text_projection": cast(params["text_projection"]),
        "layers": [],
    }
    for lyr in params["layers"]:
        w_qkv = jnp.concatenate([lyr["w_qkv"][:, :D] * scale, lyr["w_qkv"][:, D:]], axis=1)
        b_qkv = jnp.concatenate([lyr["b_qkv"][:D] * scale, lyr["b_qkv"][D:]], axis=0)
        out["layers"].append({
            "ln1_g": cast(lyr["ln1_g"]), "ln1_b": cast(lyr["ln1_b"]),
            "w_qkv": cast(w_qkv), "b_qkv": cast(b_qkv),
            "w_o": cast(lyr["w_o"]), "b_o": cast(lyr["b_o"]),
            "ln2_g": cast(lyr["ln2_g"]), "ln2_b": cast(lyr["ln2_b"]),
            "w_fc": cast(lyr["w_fc"]), "b_fc": cast(lyr["b_fc"]),
            "w_proj": cast(lyr["w_proj"]), "b_proj": cast(lyr["b_proj"]),
        })
    return out


def text_encoder_forward(params, prompts, tokenized_prompts, n_heads):
    """`params` must come from prepare_params (q weights pre-scaled)."""
    B, L, D = prompts.shape
    x = prompts
    pe = params["positional_embedding"]
    for li, lyr in enumerate(params["layers"]):
        # attention sub-block (positional-embedding add fused into layer 0's kernel)
        x = attention_block(x, pe if li == 0 else None,
                            lyr["ln1_g"], lyr["ln1_b"],
                            lyr["w_qkv"], lyr["b_qkv"], lyr["w_o"], lyr["b_o"],
                            n_heads)
        # MLP sub-block over the flattened (B*L, D) view (reshape is metadata-only)
        x = mlp_block(x.reshape(B * L, D),
                      lyr["ln2_g"], lyr["ln2_b"],
                      lyr["w_fc"], lyr["b_fc"], lyr["w_proj"], lyr["b_proj"]).reshape(B, L, D)
    # EOT gather: argmax + B-row gather in the wrapper (tiny), then fused LN_final + projection
    idx = jnp.argmax(tokenized_prompts, axis=-1)
    x_eot = x[jnp.arange(B), idx]                                           # (B, D)
    return final_projection(x_eot, params["lnf_g"], params["lnf_b"], params["text_projection"])


# --------------------------------------------------------------------------- #
# parameters + pure-JAX reference (same math, for the correctness check)
# --------------------------------------------------------------------------- #
def init_params(key, n_layers, seq_len, d_model, d_mlp, proj_dim):
    k_pe, k_proj, *k_layers = jax.random.split(key, 2 + n_layers)
    params = {
        "positional_embedding": 0.01 * jax.random.normal(k_pe, (seq_len, d_model), jnp.float32),
        "lnf_g": jnp.ones((d_model,), jnp.float32),
        "lnf_b": jnp.zeros((d_model,), jnp.float32),
        "text_projection": 0.05 * jax.random.normal(k_proj, (d_model, proj_dim), jnp.float32),
        "layers": [],
    }
    for kl in k_layers:
        k0, k1, k2, k3 = jax.random.split(kl, 4)
        params["layers"].append({
            "ln1_g": jnp.ones((d_model,), jnp.float32),
            "ln1_b": jnp.zeros((d_model,), jnp.float32),
            "w_qkv": 0.05 * jax.random.normal(k0, (d_model, 3 * d_model), jnp.float32),
            "b_qkv": jnp.zeros((3 * d_model,), jnp.float32),
            "w_o": 0.05 * jax.random.normal(k1, (d_model, d_model), jnp.float32),
            "b_o": jnp.zeros((d_model,), jnp.float32),
            "ln2_g": jnp.ones((d_model,), jnp.float32),
            "ln2_b": jnp.zeros((d_model,), jnp.float32),
            "w_fc": 0.05 * jax.random.normal(k2, (d_model, d_mlp), jnp.float32),
            "b_fc": jnp.zeros((d_mlp,), jnp.float32),
            "w_proj": 0.05 * jax.random.normal(k3, (d_mlp, d_model), jnp.float32),
            "b_proj": jnp.zeros((d_model,), jnp.float32),
        })
    return params


def reference_forward(params, prompts, tokenized_prompts, n_heads):
    B, L, D = prompts.shape
    dh = D // n_heads

    def ln(x, g, b, eps=1e-5):
        mu = jnp.mean(x, axis=-1, keepdims=True)
        var = jnp.mean((x - mu) ** 2, axis=-1, keepdims=True)
        return (x - mu) / jnp.sqrt(var + eps) * g + b

    x = prompts + params["positional_embedding"][None]
    mask = jnp.tril(jnp.ones((L, L), dtype=bool))
    for lyr in params["layers"]:
        h = ln(x, lyr["ln1_g"], lyr["ln1_b"])
        qkv = h @ lyr["w_qkv"] + lyr["b_qkv"]
        q, k, v = jnp.split(qkv, 3, axis=-1)
        q = q.reshape(B, L, n_heads, dh).transpose(0, 2, 1, 3)
        k = k.reshape(B, L, n_heads, dh).transpose(0, 2, 1, 3)
        v = v.reshape(B, L, n_heads, dh).transpose(0, 2, 1, 3)
        s = jnp.einsum("bhqd,bhkd->bhqk", q, k) / math.sqrt(dh)
        s = jnp.where(mask[None, None], s, -jnp.inf)
        p = jax.nn.softmax(s, axis=-1)
        a = jnp.einsum("bhqk,bhkd->bhqd", p, v).transpose(0, 2, 1, 3).reshape(B, L, D)
        x = x + (a @ lyr["w_o"] + lyr["b_o"])
        h2 = ln(x, lyr["ln2_g"], lyr["ln2_b"])
        mfc = h2 @ lyr["w_fc"] + lyr["b_fc"]
        mfc = mfc * jax.nn.sigmoid(1.702 * mfc)
        x = x + (mfc @ lyr["w_proj"] + lyr["b_proj"])
    x = ln(x, params["lnf_g"], params["lnf_b"])
    idx = jnp.argmax(tokenized_prompts, axis=-1)
    return x[jnp.arange(B), idx] @ params["text_projection"]


# --------------------------------------------------------------------------- #
# harness
# --------------------------------------------------------------------------- #
if __name__ == "__main__":
    B, L, D, HEADS, LAYERS, MLP, PROJ = 2, 8, 32, 4, 2, 128, 32

    key = jax.random.PRNGKey(0)
    kp, kx, kt = jax.random.split(key, 3)
    params = init_params(kp, LAYERS, L, D, MLP, PROJ)
    prompts = 0.1 * jax.random.normal(kx, (B, L, D), dtype=jnp.float32)
    tokenized = jax.random.randint(kt, (B, L), 1, 400, dtype=jnp.int32)
    eot_pos = jnp.array([5, 7], dtype=jnp.int32)          # EOT token (max id) per row
    tokenized = tokenized.at[jnp.arange(B), eot_pos].set(49407)

    ref = reference_forward(params, prompts, tokenized, n_heads=HEADS)

    # f32 path (native f32 operands, f32 accumulation)
    p32 = prepare_params(params, HEADS)
    out = text_encoder_forward(p32, prompts, tokenized, n_heads=HEADS)
    out = jax.block_until_ready(out)
    assert out.shape == (B, PROJ)
    assert jnp.allclose(out, ref, atol=3e-3, rtol=3e-3), float(jnp.max(jnp.abs(out - ref)))

    # bf16 path (what a reduced-precision CLIP checkpoint would use: bf16 MXU operands,
    # f32 accumulation / LN stats / softmax inside the kernels)
    pbf = prepare_params(params, HEADS, dtype=jnp.bfloat16)
    out_bf = text_encoder_forward(pbf, prompts.astype(jnp.bfloat16), tokenized, n_heads=HEADS)
    out_bf = jax.block_until_ready(out_bf).astype(jnp.float32)
    assert out_bf.shape == (B, PROJ)
    assert jnp.allclose(out_bf, ref, atol=6e-2, rtol=0), float(jnp.max(jnp.abs(out_bf - ref)))

    print("KERNEL_OK")
</pallas_src>

<mosaic_0001>
module attributes {stable_mosaic.version = 11 : i64} {
  func.func @_attn_block_kernel(%arg0: i32, %arg1: memref<1x8x32xf32, #tpu.memory_space<vmem>>, %arg2: memref<8x32xf32, #tpu.memory_space<vmem>>, %arg3: memref<1x32xf32, #tpu.memory_space<vmem>>, %arg4: memref<1x32xf32, #tpu.memory_space<vmem>>, %arg5: memref<32x96xf32, #tpu.memory_space<vmem>>, %arg6: memref<1x96xf32, #tpu.memory_space<vmem>>, %arg7: memref<32x32xf32, #tpu.memory_space<vmem>>, %arg8: memref<1x32xf32, #tpu.memory_space<vmem>>, %arg9: memref<1x8x32xf32, #tpu.memory_space<vmem>>) attributes {dimension_semantics = [#tpu.dimension_semantics<parallel>], iteration_bounds = array<i64: 2>, scalar_prefetch = 0 : i64, scratch_operands = 0 : i64, tpu.core_type = #tpu.core_type<tc>, window_params = [{transform_indices = @transform_0, window_bounds = array<i64: 1, 8, 32>}, {pipeline_mode = #tpu.pipeline_mode<synchronous>, transform_indices = @transform_1, window_bounds = array<i64: 8, 32>}, {pipeline_mode = #tpu.pipeline_mode<synchronous>, transform_indices = @transform_2, window_bounds = array<i64: 1, 32>}, {pipeline_mode = #tpu.pipeline_mode<synchronous>, transform_indices = @transform_3, window_bounds = array<i64: 1, 32>}, {pipeline_mode = #tpu.pipeline_mode<synchronous>, transform_indices = @transform_4, window_bounds = array<i64: 32, 96>}, {pipeline_mode = #tpu.pipeline_mode<synchronous>, transform_indices = @transform_5, window_bounds = array<i64: 1, 96>}, {pipeline_mode = #tpu.pipeline_mode<synchronous>, transform_indices = @transform_6, window_bounds = array<i64: 32, 32>}, {pipeline_mode = #tpu.pipeline_mode<synchronous>, transform_indices = @transform_7, window_bounds = array<i64: 1, 32>}, {transform_indices = @transform_8, window_bounds = array<i64: 1, 8, 32>}]} {
    %c0 = arith.constant 0 : index
    %c0_0 = arith.constant 0 : index
    %c0_1 = arith.constant 0 : index
    %0 = vector.load %arg1[%c0, %c0_0, %c0_1] : memref<1x8x32xf32, #tpu.memory_space<vmem>>, vector<1x8x32xf32>
    %1 = vector.shape_cast %0 : vector<1x8x32xf32> to vector<8x32xf32>
    %c0_2 = arith.constant 0 : index
    %c0_3 = arith.constant 0 : index
    %2 = vector.load %arg2[%c0_2, %c0_3] : memref<8x32xf32, #tpu.memory_space<vmem>>, vector<8x32xf32>
    %3 = arith.addf %1, %2 : vector<8x32xf32>
    %cst = arith.constant dense<0.000000e+00> : vector<8xf32>
    %4 = vector.multi_reduction <add>, %3, %cst [1] : vector<8x32xf32> to vector<8xf32>
    %5 = vector.shape_cast %4 : vector<8xf32> to vector<8x1xf32>
    %cst_4 = arith.constant 3.200000e+01 : f32
    %6 = vector.broadcast %cst_4 : f32 to vector<8x1xf32>
    %7 = arith.divf %5, %6 : vector<8x1xf32>
    %8 = vector.broadcast %7 : vector<8x1xf32> to vector<8x32xf32>
    %9 = arith.subf %3, %8 : vector<8x32xf32>
    %10 = arith.mulf %9, %9 : vector<8x32xf32>
    %cst_5 = arith.constant dense<0.000000e+00> : vector<8xf32>
    %11 = vector.multi_reduction <add>, %10, %cst_5 [1] : vector<8x32xf32> to vector<8xf32>
    %12 = vector.shape_cast %11 : vector<8xf32> to vector<8x1xf32>
    %cst_6 = arith.constant 3.200000e+01 : f32
    %13 = vector.broadcast %cst_6 : f32 to vector<8x1xf32>
    %14 = arith.divf %12, %13 : vector<8x1xf32>
    %cst_7 = arith.constant 9.99999974E-6 : f32
    %15 = vector.broadcast %cst_7 : f32 to vector<8x1xf32>
    %16 = arith.addf %14, %15 : vector<8x1xf32>
    %17 = math.rsqrt %16 : vector<8x1xf32>
    %18 = vector.broadcast %17 : vector<8x1xf32> to vector<8x32xf32>
    %19 = arith.mulf %9, %18 : vector<8x32xf32>
    %c0_8 = arith.constant 0 : index
    %c0_9 = arith.constant 0 : index
    %20 = vector.load %arg3[%c0_8, %c0_9] : memref<1x32xf32, #tpu.memory_space<vmem>>, vector<1x32xf32>
    %21 = vector.broadcast %20 : vector<1x32xf32> to vector<8x32xf32>
    %22 = arith.mulf %19, %21 : vector<8x32xf32>
    %c0_10 = arith.constant 0 : index
    %c0_11 = arith.constant 0 : index
    %23 = vector.load %arg4[%c0_10, %c0_11] : memref<1x32xf32, #tpu.memory_space<vmem>>, vector<1x32xf32>
    %24 = vector.broadcast %23 : vector<1x32xf32> to vector<8x32xf32>
    %25 = arith.addf %22, %24 : vector<8x32xf32>
    %c0_12 = arith.constant 0 : index
    %c0_13 = arith.constant 0 : index
    %26 = vector.load %arg5[%c0_12, %c0_13] : memref<32x96xf32, #tpu.memory_space<vmem>>, vector<32x96xf32>
    %cst_14 = arith.constant dense<0.000000e+00> : vector<8x96xf32>
    %27 = tpu.matmul %25, %26, %cst_14 {dimension_numbers = #tpu.dot_dimension_numbers<[1], [0], [0], [1], [0, 0, 1, 1], [], []>} : vector<8x32xf32>, vector<32x96xf32>, vector<8x96xf32> -> vector<8x96xf32>
    %c0_15 = arith.constant 0 : index
    %c0_16 = arith.constant 0 : index
    %28 = vector.load %arg6[%c0_15, %c0_16] : memref<1x96xf32, #tpu.memory_space<vmem>>, vector<1x96xf32>
    %29 = vector.broadcast %28 : vector<1x96xf32> to vector<8x96xf32>
    %30 = arith.addf %27, %29 : vector<8x96xf32>
    %31 = vector.extract_strided_slice %30 {offsets = [0, 0], sizes = [8, 32], strides = [1, 1]} : vector<8x96xf32> to vector<8x32xf32>
    %32 = vector.extract_strided_slice %30 {offsets = [0, 32], sizes = [8, 32], strides = [1, 1]} : vector<8x96xf32> to vector<8x32xf32>
    %33 = vector.extract_strided_slice %30 {offsets = [0, 64], sizes = [8, 32], strides = [1, 1]} : vector<8x96xf32> to vector<8x32xf32>
    %34 = tpu.iota {dimensions = array<i32: 0>} : vector<8x8xi32>
    %35 = tpu.iota {dimensions = array<i32: 1>} : vector<8x8xi32>
    %36 = arith.cmpi sle, %35, %34 : vector<8x8xi32>
    %c0_17 = arith.constant 0 : index
    %c0_18 = arith.constant 0 : index
    %37 = vector.load %arg8[%c0_17, %c0_18] : memref<1x32xf32, #tpu.memory_space<vmem>>, vector<1x32xf32>
    %38 = vector.broadcast %37 : vector<1x32xf32> to vector<8x32xf32>
    %39 = arith.addf %3, %38 : vector<8x32xf32>
    %40 = vector.extract_strided_slice %31 {offsets = [0, 0], sizes = [8, 8], strides = [1, 1]} : vector<8x32xf32> to vector<8x8xf32>
    %41 = vector.extract_strided_slice %32 {offsets = [0, 0], sizes = [8, 8], strides = [1, 1]} : vector<8x32xf32> to vector<8x8xf32>
    %cst_19 = arith.constant dense<0.000000e+00> : vector<8x8xf32>
    %42 = tpu.matmul %40, %41, %cst_19 {dimension_numbers = #tpu.dot_dimension_numbers<[1], [1], [0], [0], [0, 0, 1, 0], [], []>} : vector<8x8xf32>, vector<8x8xf32>, vector<8x8xf32> -> vector<8x8xf32>
    %cst_20 = arith.constant -1.000000e+30 : f32
    %43 = vector.broadcast %cst_20 : f32 to vector<8x8xf32>
    %44 = arith.select %36, %42, %43 : vector<8x8xi1>, vector<8x8xf32>
    %cst_21 = arith.constant dense<0xFF800000> : vector<8xf32>
    %45 = vector.multi_reduction <maximumf>, %44, %cst_21 [1] : vector<8x8xf32> to vector<8xf32>
    %46 = vector.shape_cast %45 : vector<8xf32> to vector<8x1xf32>
    %47 = vector.broadcast %46 : vector<8x1xf32> to vector<8x8xf32>
    %48 = arith.subf %44, %47 : vector<8x8xf32>
    %49 = math.exp %48 : vector<8x8xf32>
    %cst_22 = arith.constant dense<0.000000e+00> : vector<8xf32>
    %50 = vector.multi_reduction <add>, %49, %cst_22 [1] : vector<8x8xf32> to vector<8xf32>
    %51 = vector.shape_cast %50 : vector<8xf32> to vector<8x1xf32>
    %52 = tpu.reciprocal %51 {approx = true} : vector<8x1xf32> -> vector<8x1xf32>
    %53 = vector.extract_strided_slice %33 {offsets = [0, 0], sizes = [8, 8], strides = [1, 1]} : vector<8x32xf32> to vector<8x8xf32>
    %cst_23 = arith.constant dense<0.000000e+00> : vector<8x8xf32>
    %54 = tpu.matmul %49, %53, %cst_23 {dimension_numbers = #tpu.dot_dimension_numbers<[1], [0], [0], [1], [0, 0, 1, 1], [], []>} : vector<8x8xf32>, vector<8x8xf32>, vector<8x8xf32> -> vector<8x8xf32>
    %55 = vector.broadcast %52 : vector<8x1xf32> to vector<8x8xf32>
    %56 = arith.mulf %54, %55 : vector<8x8xf32>
    %c0_24 = arith.constant 0 : index
    %c0_25 = arith.constant 0 : index
    %57 = vector.load %arg7[%c0_24, %c0_25] : memref<32x32xf32, #tpu.memory_space<vmem>>, vector<8x32xf32>
    %cst_26 = arith.constant dense<0.000000e+00> : vector<8x32xf32>
    %58 = tpu.matmul %56, %57, %cst_26 {dimension_numbers = #tpu.dot_dimension_numbers<[1], [0], [0], [1], [0, 0, 1, 1], [], []>} : vector<8x8xf32>, vector<8x32xf32>, vector<8x32xf32> -> vector<8x32xf32>
    %59 = arith.addf %39, %58 : vector<8x32xf32>
    %60 = vector.extract_strided_slice %31 {offsets = [0, 8], sizes = [8, 8], strides = [1, 1]} : vector<8x32xf32> to vector<8x8xf32>
    %61 = vector.extract_strided_slice %32 {offsets = [0, 8], sizes = [8, 8], strides = [1, 1]} : vector<8x32xf32> to vector<8x8xf32>
    %cst_27 = arith.constant dense<0.000000e+00> : vector<8x8xf32>
    %62 = tpu.matmul %60, %61, %cst_27 {dimension_numbers = #tpu.dot_dimension_numbers<[1], [1], [0], [0], [0, 0, 1, 0], [], []>} : vector<8x8xf32>, vector<8x8xf32>, vector<8x8xf32> -> vector<8x8xf32>
    %cst_28 = arith.constant -1.000000e+30 : f32
    %63 = vector.broadcast %cst_28 : f32 to vector<8x8xf32>
    %64 = arith.select %36, %62, %63 : vector<8x8xi1>, vector<8x8xf32>
    %cst_29 = arith.constant dense<0xFF800000> : vector<8xf32>
    %65 = vector.multi_reduction <maximumf>, %64, %cst_29 [1] : vector<8x8xf32> to vector<8xf32>
    %66 = vector.shape_cast %65 : vector<8xf32> to vector<8x1xf32>
    %67 = vector.broadcast %66 : vector<8x1xf32> to vector<8x8xf32>
    %68 = arith.subf %64, %67 : vector<8x8xf32>
    %69 = math.exp %68 : vector<8x8xf32>
    %cst_30 = arith.constant dense<0.000000e+00> : vector<8xf32>
    %70 = vector.multi_reduction <add>, %69, %cst_30 [1] : vector<8x8xf32> to vector<8xf32>
    %71 = vector.shape_cast %70 : vector<8xf32> to vector<8x1xf32>
    %72 = tpu.reciprocal %71 {approx = true} : vector<8x1xf32> -> vector<8x1xf32>
    %73 = vector.extract_strided_slice %33 {offsets = [0, 8], sizes = [8, 8], strides = [1, 1]} : vector<8x32xf32> to vector<8x8xf32>
    %cst_31 = arith.constant dense<0.000000e+00> : vector<8x8xf32>
    %74 = tpu.matmul %69, %73, %cst_31 {dimension_numbers = #tpu.dot_dimension_numbers<[1], [0], [0], [1], [0, 0, 1, 1], [], []>} : vector<8x8xf32>, vector<8x8xf32>, vector<8x8xf32> -> vector<8x8xf32>
    %75 = vector.broadcast %72 : vector<8x1xf32> to vector<8x8xf32>
    %76 = arith.mulf %74, %75 : vector<8x8xf32>
    %c8 = arith.constant 8 : index
    %c0_32 = arith.constant 0 : index
    %77 = vector.load %arg7[%c8, %c0_32] : memref<32x32xf32, #tpu.memory_space<vmem>>, vector<8x32xf32>
    %cst_33 = arith.constant dense<0.000000e+00> : vector<8x32xf32>
    %78 = tpu.matmul %76, %77, %cst_33 {dimension_numbers = #tpu.dot_dimension_numbers<[1], [0], [0], [1], [0, 0, 1, 1], [], []>} : vector<8x8xf32>, vector<8x32xf32>, vector<8x32xf32> -> vector<8x32xf32>
    %79 = arith.addf %59, %78 : vector<8x32xf32>
    %80 = vector.extract_strided_slice %31 {offsets = [0, 16], sizes = [8, 8], strides = [1, 1]} : vector<8x32xf32> to vector<8x8xf32>
    %81 = vector.extract_strided_slice %32 {offsets = [0, 16], sizes = [8, 8], strides = [1, 1]} : vector<8x32xf32> to vector<8x8xf32>
    %cst_34 = arith.constant dense<0.000000e+00> : vector<8x8xf32>
    %82 = tpu.matmul %80, %81, %cst_34 {dimension_numbers = #tpu.dot_dimension_numbers<[1], [1], [0], [0], [0, 0, 1, 0], [], []>} : vector<8x8xf32>, vector<8x8xf32>, vector<8x8xf32> -> vector<8x8xf32>
    %cst_35 = arith.constant -1.000000e+30 : f32
    %83 = vector.broadcast %cst_35 : f32 to vector<8x8xf32>
    %84 = arith.select %36, %82, %83 : vector<8x8xi1>, vector<8x8xf32>
    %cst_36 = arith.constant dense<0xFF800000> : vector<8xf32>
    %85 = vector.multi_reduction <maximumf>, %84, %cst_36 [1] : vector<8x8xf32> to vector<8xf32>
    %86 = vector.shape_cast %85 : vector<8xf32> to vector<8x1xf32>
    %87 = vector.broadcast %86 : vector<8x1xf32> to vector<8x8xf32>
    %88 = arith.subf %84, %87 : vector<8x8xf32>
    %89 = math.exp %88 : vector<8x8xf32>
    %cst_37 = arith.constant dense<0.000000e+00> : vector<8xf32>
    %90 = vector.multi_reduction <add>, %89, %cst_37 [1] : vector<8x8xf32> to vector<8xf32>
    %91 = vector.shape_cast %90 : vector<8xf32> to vector<8x1xf32>
    %92 = tpu.reciprocal %91 {approx = true} : vector<8x1xf32> -> vector<8x1xf32>
    %93 = vector.extract_strided_slice %33 {offsets = [0, 16], sizes = [8, 8], strides = [1, 1]} : vector<8x32xf32> to vector<8x8xf32>
    %cst_38 = arith.constant dense<0.000000e+00> : vector<8x8xf32>
    %94 = tpu.matmul %89, %93, %cst_38 {dimension_numbers = #tpu.dot_dimension_numbers<[1], [0], [0], [1], [0, 0, 1, 1], [], []>} : vector<8x8xf32>, vector<8x8xf32>, vector<8x8xf32> -> vector<8x8xf32>
    %95 = vector.broadcast %92 : vector<8x1xf32> to vector<8x8xf32>
    %96 = arith.mulf %94, %95 : vector<8x8xf32>
    %c16 = arith.constant 16 : index
    %c0_39 = arith.constant 0 : index
    %97 = vector.load %arg7[%c16, %c0_39] : memref<32x32xf32, #tpu.memory_space<vmem>>, vector<8x32xf32>
    %cst_40 = arith.constant dense<0.000000e+00> : vector<8x32xf32>
    %98 = tpu.matmul %96, %97, %cst_40 {dimension_numbers = #tpu.dot_dimension_numbers<[1], [0], [0], [1], [0, 0, 1, 1], [], []>} : vector<8x8xf32>, vector<8x32xf32>, vector<8x32xf32> -> vector<8x32xf32>
    %99 = arith.addf %79, %98 : vector<8x32xf32>
    %100 = vector.extract_strided_slice %31 {offsets = [0, 24], sizes = [8, 8], strides = [1, 1]} : vector<8x32xf32> to vector<8x8xf32>
    %101 = vector.extract_strided_slice %32 {offsets = [0, 24], sizes = [8, 8], strides = [1, 1]} : vector<8x32xf32> to vector<8x8xf32>
    %cst_41 = arith.constant dense<0.000000e+00> : vector<8x8xf32>
    %102 = tpu.matmul %100, %101, %cst_41 {dimension_numbers = #tpu.dot_dimension_numbers<[1], [1], [0], [0], [0, 0, 1, 0], [], []>} : vector<8x8xf32>, vector<8x8xf32>, vector<8x8xf32> -> vector<8x8xf32>
    %cst_42 = arith.constant -1.000000e+30 : f32
    %103 = vector.broadcast %cst_42 : f32 to vector<8x8xf32>
    %104 = arith.select %36, %102, %103 : vector<8x8xi1>, vector<8x8xf32>
    %cst_43 = arith.constant dense<0xFF800000> : vector<8xf32>
    %105 = vector.multi_reduction <maximumf>, %104, %cst_43 [1] : vector<8x8xf32> to vector<8xf32>
    %106 = vector.shape_cast %105 : vector<8xf32> to vector<8x1xf32>
    %107 = vector.broadcast %106 : vector<8x1xf32> to vector<8x8xf32>
    %108 = arith.subf %104, %107 : vector<8x8xf32>
    %109 = math.exp %108 : vector<8x8xf32>
    %cst_44 = arith.constant dense<0.000000e+00> : vector<8xf32>
    %110 = vector.multi_reduction <add>, %109, %cst_44 [1] : vector<8x8xf32> to vector<8xf32>
    %111 = vector.shape_cast %110 : vector<8xf32> to vector<8x1xf32>
    %112 = tpu.reciprocal %111 {approx = true} : vector<8x1xf32> -> vector<8x1xf32>
    %113 = vector.extract_strided_slice %33 {offsets = [0, 24], sizes = [8, 8], strides = [1, 1]} : vector<8x32xf32> to vector<8x8xf32>
    %cst_45 = arith.constant dense<0.000000e+00> : vector<8x8xf32>
    %114 = tpu.matmul %109, %113, %cst_45 {dimension_numbers = #tpu.dot_dimension_numbers<[1], [0], [0], [1], [0, 0, 1, 1], [], []>} : vector<8x8xf32>, vector<8x8xf32>, vector<8x8xf32> -> vector<8x8xf32>
    %115 = vector.broadcast %112 : vector<8x1xf32> to vector<8x8xf32>
    %116 = arith.mulf %114, %115 : vector<8x8xf32>
    %c24 = arith.constant 24 : index
    %c0_46 = arith.constant 0 : index
    %117 = vector.load %arg7[%c24, %c0_46] : memref<32x32xf32, #tpu.memory_space<vmem>>, vector<8x32xf32>
    %cst_47 = arith.constant dense<0.000000e+00> : vector<8x32xf32>
    %118 = tpu.matmul %116, %117, %cst_47 {dimension_numbers = #tpu.dot_dimension_numbers<[1], [0], [0], [1], [0, 0, 1, 1], [], []>} : vector<8x8xf32>, vector<8x32xf32>, vector<8x32xf32> -> vector<8x32xf32>
    %119 = arith.addf %99, %118 : vector<8x32xf32>
    %c0_48 = arith.constant 0 : index
    %c0_49 = arith.constant 0 : index
    %c0_50 = arith.constant 0 : index
    %120 = vector.load %arg9[%c0_48, %c0_49, %c0_50] : memref<1x8x32xf32, #tpu.memory_space<vmem>>, vector<1x8x32xf32>
    %121 = vector.shape_cast %120 : vector<1x8x32xf32> to vector<8x32xf32>
    %122 = vector.shape_cast %119 : vector<8x32xf32> to vector<1x8x32xf32>
    tpu.vector_store %arg9[%c0_48, %c0_49, %c0_50], %122 {strides = array<i32>} : memref<1x8x32xf32, #tpu.memory_space<vmem>>, vector<1x8x32xf32>,
    return
  }
  func.func @transform_0(%arg0: i32) -> (i32, i32, i32) {
    %c0_i32 = arith.constant 0 : i32
    %c0_i32_0 = arith.constant 0 : i32
    %c0_i32_1 = arith.constant 0 : i32
    return %arg0, %c0_i32, %c0_i32_0 : i32, i32, i32
  }
  func.func @transform_1(%arg0: i32) -> (i32, i32) {
    %c0_i32 = arith.constant 0 : i32
    %c0_i32_0 = arith.constant 0 : i32
    %c0_i32_1 = arith.constant 0 : i32
    return %c0_i32, %c0_i32_0 : i32, i32
  }
  func.func @transform_2(%arg0: i32) -> (i32, i32) {
    %c0_i32 = arith.constant 0 : i32
    %c0_i32_0 = arith.constant 0 : i32
    %c0_i32_1 = arith.constant 0 : i32
    return %c0_i32, %c0_i32_0 : i32, i32
  }
  func.func @transform_3(%arg0: i32) -> (i32, i32) {
    %c0_i32 = arith.constant 0 : i32
    %c0_i32_0 = arith.constant 0 : i32
    %c0_i32_1 = arith.constant 0 : i32
    return %c0_i32, %c0_i32_0 : i32, i32
  }
  func.func @transform_4(%arg0: i32) -> (i32, i32) {
    %c0_i32 = arith.constant 0 : i32
    %c0_i32_0 = arith.constant 0 : i32
    %c0_i32_1 = arith.constant 0 : i32
    return %c0_i32, %c0_i32_0 : i32, i32
  }
  func.func @transform_5(%arg0: i32) -> (i32, i32) {
    %c0_i32 = arith.constant 0 : i32
    %c0_i32_0 = arith.constant 0 : i32
    %c0_i32_1 = arith.constant 0 : i32
    return %c0_i32, %c0_i32_0 : i32, i32
  }
  func.func @transform_6(%arg0: i32) -> (i32, i32) {
    %c0_i32 = arith.constant 0 : i32
    %c0_i32_0 = arith.constant 0 : i32
    %c0_i32_1 = arith.constant 0 : i32
    return %c0_i32, %c0_i32_0 : i32, i32
  }
  func.func @transform_7(%arg0: i32) -> (i32, i32) {
    %c0_i32 = arith.constant 0 : i32
    %c0_i32_0 = arith.constant 0 : i32
    %c0_i32_1 = arith.constant 0 : i32
    return %c0_i32, %c0_i32_0 : i32, i32
  }
  func.func @transform_8(%arg0: i32) -> (i32, i32, i32) {
    %c0_i32 = arith.constant 0 : i32
    %c0_i32_0 = arith.constant 0 : i32
    %c0_i32_1 = arith.constant 0 : i32
    return %arg0, %c0_i32, %c0_i32_0 : i32, i32, i32
  }
}

</mosaic_0001>

<bundles_post_ra>
// kernel: tpu_custom_call.1
= control target key start
LH: loop header
LB: loop body
LE: loop exit
PB: predicated region body
PF: predicated region fallthrough
CT: control target
= control target key end

     0   :  { %s2459_s0 = inlined_call_operand.hbm [shape: f32[2,8,32], index: 0, kind: input, shape index: {}]   ;;  %s2460_s1 = inlined_call_operand.hbm [shape: f32[8,32], index: 1, kind: input, shape index: {}]   ;;  %s2461_s2 = inlined_call_operand.vmem [shape: f32[1,32], index: 2, kind: input, shape index: {}]   ;;  %s2462_s3 = inlined_call_operand.vmem [shape: f32[1,32], index: 3, kind: input, shape index: {}]   ;;  %s2463_s4 = inlined_call_operand.hbm [shape: f32[32,96], index: 4, kind: input, shape index: {}]   ;;  %s2464_s5 = inlined_call_operand.vmem [shape: f32[1,96], index: 5, kind: input, shape index: {}]   ;;  %s2465_s6 = inlined_call_operand.hbm [shape: f32[32,32], index: 6, kind: input, shape index: {}]   ;;  %s2466_s7 = inlined_call_operand.vmem [shape: f32[1,32], index: 7, kind: input, shape index: {}]   ;;  %s2467_s8 = inlined_call_operand.hbm [shape: f32[2,8,32], index: 8, kind: output, shape index: {}]  }
   0x1   :  { %2471 = sst [smem:[#allocation15_spill]] %s2460_s1 }
   0x2   :  { %13 = vsyncpa [#allocation3], 0 }
   0x3   :  { %15 = vsyncpa [#allocation3 + $0x1], 0 }
   0x4   :  { %16 = vsyncpa [#allocation6], 0 }
   0x5   :  { %17 = vsyncpa [#allocation9], 0 }
   0x6   :  { %18 = vsyncpa [#allocation4], 0 }
   0x7   :  { %20 = vsyncpa [#allocation4 + $0x1], 0  ;;  %s2090_s27 = smov 0   ;;  %s2092_s28 = smov 0  }
   0x8   :  { %s2094_s29 = smov 0   ;;  %s2096_s30 = smov 0  }
   0x9 LB: > { %s2111_s9 = sadd.s32 4294967295, %s2022_s30   ;;  %s1572_s10 = sadd.s32 4294967294, %s2022_s30   ;;  %s2022_s30 = sphi %s2096_s30, %s2492_s30   ;;  %s2018_s29 = sphi %s2094_s29, %s2491_s29   ;;  %s2014_s28 = sphi %s2092_s28, %s2490_s28   ;;  %s2010_s27 = sphi %s2090_s27, %s2489_s27  }
   0xa   : > { %p46_p0 = scmp.ne.s32.totalorder %s2014_s28, %s2010_s27  ;;  %p2468_p1 = scmp.eq.s32.totalorder %s2111_s9, 0 }
   0xb   : > { %p223_p3 = scmp.eq.s32.totalorder %s1572_s10, 1  ;;  %p1573_p5 = scmp.ge.s32.totalorder %s2022_s30, 1 }
   0xc   : > { %p2120_p4 = por %p2468_p1, %p46_p0  ;;  %p230_p7 = scmp.lt.s32.totalorder %s2022_s30, 3 }
   0xd   : > { %p2125_p6 = por %p223_p3, %p46_p0  ;;  %s2024_s14 = smov [#allocation5]  }
   0xe   : > { %s2472_s11 = scalar_select %p2120_p4, 1, 0 }
   0xf   : > { %s2473_s12 = scalar_select %p2125_p6, 1, 0 }
  0x10   : > { %p2130_p8 = pnand %p1573_p5, %p230_p7  ;;  %s243_s15 = sshll.u32 %s2024_s14, 4  ;;  %s244_s15 = int_to_ptr.vmem [resolvable:$true] %s243_s15 }
  0x11   : > { %s2025_s16 = smov [#allocation7]   ;;  %s2026_s19 = smov [#allocation8]  }
  0x12   : > { %s2474_s13 = scalar_select %p2130_p8, 1, 0 }
  0x13   : > { %p1739_p10 = pneg %p2130_p8  ;;  %s259_s17 = sshll.u32 %s2025_s16, 4  ;;  %s2143_s17 = int_to_ptr.vmem [resolvable:$true] %s259_s17 }
  0x14   : > { %s2145_s20 = sshll.u32 %s2026_s19, 4  ;;  %s2476_s1 = sld [smem:[#allocation15_spill]]  ;;  %s276_s20 = int_to_ptr.vmem [resolvable:$true] %s2145_s20 }
  0x15   : > { %p2139_p11 = pnand %p1739_p10, %p2468_p1 }
  0x17   : > { %p2155_p13 = pneg %p2139_p11 }
  0x1a   : > { %s1834_s23 = scalar_lea.hbm %s2476_s1, 128 }
  0x1b   : > { %p1835_p12 = scmp.ne.s32.totalorder %s2476_s1, %s1834_s23  ;;  %p1841_p5 = scmp.lt.u32.totalorder %s1834_s23, %s2476_s1 }
  0x1d   : > { %p1837_p0 = pnand %p2155_p13, %p1835_p12 }
  0x1f   : > { %p1838_p3 = pneg %p1837_p0 }
  0x21   : > { %p1843_p7 = pnand %p1841_p5, %p1838_p3 }
  0x23   : > { %1846 = shalt.err (!%p1843_p7)
}
  0x24   : > { %s1847_s16 = scalar_lea.vmem %s244_s15, 128  ;;  %p1855_p2 = scmp.lt.s32.totalorder %s244_s15, %s244_s15 }
  0x25   : > { %p1848_p10 = scmp.ne.s32.totalorder %s244_s15, %s1847_s16  ;;  %p1856_p6 = scmp.lt.s32.totalorder %s1847_s16, %s1847_s16 }
  0x27   : > { %p1850_p9 = pnand %p1848_p10, %p2155_p13  ;;  %p1857_p4 = por %p1856_p6, %p1855_p2 }
  0x29   : > { %p1851_p1 = pneg %p1850_p9 }
  0x2b   : > { %p1858_p8 = pnand %p1857_p4, %p1851_p1 }
  0x2d   : > { %1861 = shalt.err (!%p1858_p8)
}
  0x2e   : > { %1742 = dma.hbm_to_vmem [thread:$0]  (!%p2139_p11), %s2476_s1, 128, %s244_s15, [#allocation6]  }
  0x2f   : > { %s1862_s24 = scalar_lea.hbm %s2463_s4, 512 }
  0x30   : > { %p1863_p9 = scmp.ne.s32.totalorder %s2463_s4, %s1862_s24  ;;  %p1869_p1 = scmp.lt.u32.totalorder %s1862_s24, %s2463_s4 }
  0x32   : > { %p1865_p12 = pnand %p1863_p9, %p2155_p13 }
  0x34   : > { %p1866_p2 = pneg %p1865_p12 }
  0x36   : > { %p1871_p4 = pnand %p1869_p1, %p1866_p2 }
  0x38   : > { %1874 = shalt.err (!%p1871_p4)
}
  0x39   : > { %s1875_s15 = scalar_lea.vmem %s2143_s17, 512  ;;  %p1883_p3 = scmp.lt.s32.totalorder %s2143_s17, %s2143_s17 }
  0x3a   : > { %p1876_p6 = scmp.ne.s32.totalorder %s2143_s17, %s1875_s15  ;;  %p1884_p5 = scmp.lt.s32.totalorder %s1875_s15, %s1875_s15 }
  0x3c   : > { %p1878_p8 = pnand %p1876_p6, %p2155_p13  ;;  %p1885_p7 = por %p1884_p5, %p1883_p3 }
  0x3e   : > { %p1879_p0 = pneg %p1878_p8 }
  0x40   : > { %p1886_p10 = pnand %p1885_p7, %p1879_p0 }
  0x42   : > { %1889 = shalt.err (!%p1886_p10)
}
  0x43   : > { %s2027_s19 = smov 128   ;;  %s2028_s21 = smov 8  }
  0x44   : > { %1745 = dma.hbm_to_vmem [thread:$0]  (!%p2139_p11), %s2463_s4, 512, %s2143_s17, [#allocation6], %s2027_s19, %s2027_s19, %s2028_s21  }
  0x45   : > { %s1890_s10 = scalar_lea.hbm %s2465_s6, 512 }
  0x46   : > { %p1891_p9 = scmp.ne.s32.totalorder %s2465_s6, %s1890_s10  ;;  %p1897_p1 = scmp.lt.u32.totalorder %s1890_s10, %s2465_s6 }
  0x48   : > { %p1893_p12 = pnand %p1891_p9, %p2155_p13 }
  0x4a   : > { %p1894_p2 = pneg %p1893_p12 }
  0x4c   : > { %p1899_p4 = pnand %p1897_p1, %p1894_p2 }
  0x4e   : > { %1902 = shalt.err (!%p1899_p4)
}
  0x4f   : > { %s1903_s22 = scalar_lea.vmem %s276_s20, 512  ;;  %p1911_p3 = scmp.lt.s32.totalorder %s276_s20, %s276_s20 }
  0x50   : > { %p1904_p6 = scmp.ne.s32.totalorder %s276_s20, %s1903_s22  ;;  %p1912_p5 = scmp.lt.s32.totalorder %s1903_s22, %s1903_s22 }
  0x52   : > { %p1906_p8 = pnand %p1904_p6, %p2155_p13  ;;  %p1913_p7 = por %p1912_p5, %p1911_p3 }
  0x54   : > { %p1907_p0 = pneg %p1906_p8 }
  0x56   : > { %p1914_p10 = pnand %p1913_p7, %p1907_p0 }
  0x58   : > { %1917 = shalt.err (!%p1914_p10)
}
  0x59   : > { %1748 = dma.hbm_to_vmem [thread:$0]  (!%p2139_p11), %s2465_s6, 512, %s276_s20, [#allocation9], %s2027_s19, %s2027_s19, %s2028_s21  }
  0x5a   : > { %s2214_s1 = sadd.s32 1, %s2022_s30   ;;  %s33_s18 = sadd.s32 1, %s2018_s29 }
  0x5b   : > { %s30_s26 = ssub.s32 %s2022_s30, %s2214_s1  ;;  %p40_p9 = scmp.ne.s32.totalorder %s2018_s29, %s2014_s28 }
  0x5c   : > { %p31_p13 = scmp.eq.s32.totalorder %s30_s26, 0  ;;  %p41_p12 = scmp.eq.s32.totalorder %s2022_s30, 0 }
  0x5d   : > { %p1760_p2 = scmp.lt.s32.totalorder %s2022_s30, 2  ;;  %p2478_p4 = scmp.eq.s32.totalorder %s2111_s9, 1 }
  0x5e   : > { %s2224_s24 = scalar_select %p31_p13, %s2018_s29, %s33_s18  }
  0x5f   : > { %p42_p1 = por %p41_p12, %p40_p9  ;;  %p2228_p6 = por %p2478_p4, %p40_p9 }
  0x60   : > { %s292_s10 = sand.u32 1, %s2018_s29   ;;  %s1579_s14 = sshll.u32 %s2022_s30, 7 }
  0x61   : > { %s1578_s20 = sshll.u32 %s292_s10, 3  ;;  %s2237_s16 = scalar_lea.hbm %s2459_s0, %s1579_s14 }
  0x62   : > { %s296_s15 = scalar_lea.vmem [#allocation2], %s1578_s20  ;;  %p2239_p11 = pnand %p1760_p2, %p42_p1 }
  0x63   : > { %s303_s22 = sshll.u32 %s296_s15, 4  ;;  %s293_s23 = scalar_lea.sflag [#allocation3], %s292_s10  ;;  %s2243_s22 = int_to_ptr.vmem [resolvable:$true] %s303_s22 }
  0x64   : > { %s1918_s26 = scalar_lea.hbm %s2237_s16, 128  ;;  %p1920_p0 = pneg %p2239_p11 }
  0x65   : > { %p1919_p8 = scmp.ne.s32.totalorder %s2237_s16, %s1918_s26  ;;  %s1923_s20 = scalar_lea.hbm %s2459_s0, 256 }
  0x66   : > { %p1924_p7 = scmp.lt.u32.totalorder %s2237_s16, %s2459_s0  ;;  %p1925_p10 = scmp.lt.u32.totalorder %s1923_s20, %s1918_s26 }
  0x67   : > { %p1921_p3 = pnand %p1920_p0, %p1919_p8  ;;  %p1927_p9 = scmp.lt.u32.totalorder %s1918_s26, %s2237_s16 }
  0x68   : > { %p1926_p13 = por %p1925_p10, %p1924_p7 }
  0x69   : > { %p1922_p5 = pneg %p1921_p3 }
  0x6a   : > { %p1928_p12 = por %p1927_p9, %p1926_p13 }
  0x6c   : > { %p1929_p2 = pnand %p1928_p12, %p1922_p5 }
  0x6e   : > { %1932 = shalt.err (!%p1929_p2)
}
  0x6f   : > { %s1933_s10 = scalar_lea.vmem %s2243_s22, 128  ;;  %s2029_s15 = smov [#allocation2]  }
  0x70   : > { %p1934_p1 = scmp.ne.s32.totalorder %s2243_s22, %s1933_s10  ;;  %s1938_s18 = sshll.u32 %s2029_s15, 4  ;;  %s1939_s18 = int_to_ptr.vmem [resolvable:$false] %s1938_s18 }
  0x71   : > { %s1940_s14 = scalar_lea.vmem %s1939_s18, 256  ;;  %p1941_p3 = scmp.lt.s32.totalorder %s2243_s22, %s1939_s18 }
  0x72   : > { %p1936_p4 = pnand %p1934_p1, %p1920_p0  ;;  %p1942_p7 = scmp.lt.s32.totalorder %s1940_s14, %s1933_s10 }
  0x74   : > { %p1937_p8 = pneg %p1936_p4  ;;  %p1943_p10 = por %p1942_p7, %p1941_p3 }
  0x76   : > { %p1944_p13 = pnand %p1943_p10, %p1937_p8 }
  0x78   : > { %1947 = shalt.err (!%p1944_p13)
}
  0x79   : > { %1752 = dma.hbm_to_vmem [thread:$0]  (!%p2239_p11), %s2237_s16, 128, %s2243_s22, %s293_s23  }
  0x7a   : > { %p2481_p5 = scmp.ne.s32.totalorder %s2474_s13, 0 }
  0x7b   : > { %s2273_s26 = sand.u32 (!%p2481_p5), 1, %s2014_s28   ;;  %p2482_p0 = scmp.ne.s32.totalorder (!%p2481_p5), %s2472_s11, 0 }
  0x7c   : > { %312 = sbr.rel (%p2481_p5) target bundleno = 2568 (0xa08), region = 52  ;;  %s1581_s20 = sshll.u32 (!%p2481_p5), %s2273_s26, 3 }
  0x7d   : > { %s315_s19 = scalar_lea.sflag (!%p2481_p5), [#allocation3], %s2273_s26  ;;  %s318_s21 = scalar_lea.vmem (!%p2481_p5), [#allocation2], %s1581_s20 }
  0x83   : > { %1993 = dma.done.wait (%p2482_p0), %s315_s19, 128  }
  0x84   : > { %1995 = vsyncadd (%p2482_p0), %s315_s19, 4294967168  ;;  %p2483_p11 = scmp.eq.s32.totalorder %s2111_s9, 0 }
  0x86   : > { %1997 = dma.done.wait (%p2483_p11), [#allocation6], 640   ;;  %p2484_p9 = pmov %p2483_p11 }
  0x88   : > { %1999 = vsyncadd (%p2484_p9), [#allocation6], 4294966656  ;;  %p2485_p12 = pmov %p2484_p9 }
  0x89   : > { %p2486_p2 = pmov %p2484_p9 }
  0x8a   : > { %2001 = dma.done.wait (%p2485_p12), [#allocation9], 512  }
  0x8b   : > { %2003 = vsyncadd (%p2486_p2), [#allocation9], 4294966784  ;;  %v363_v0 = vld [vmem:[%s318_s21] sm:$0xff]  ;;  %v364_v1 = vld [vmem:[#allocation5] sm:$0xff]  ;;  %vm366_vm0 = vcmask 261120   ;;  %v2030_v12 = vmov 0.0|0.0   ;;  %v481_v32 = vlaneseq }
  0x8c   : > { %v2291_v2 = vadd.f32 %v364_v1, %v363_v0  ;;  %v397_v9 = vld [vmem:[#allocation7] sm:$0xff]  ;;  %v398_v10 = vld [vmem:[#allocation7 + $0x8] sm:$0xff]  ;;  %v399_v11 = vld [vmem:[#allocation7 + $0x10] sm:$0xff]  ;;  %1711 = vmatprep.subr.bf16.mxu0 %v2030_v12  ;;  %vm2031_vm1 = vmmov 0   ;;  %v2032_v15 = vmov 0.0   ;;  %s2033_s10 = smov 64  }
  0x8d   : > { %v1712_v13 = vpack.c.bf16 %v398_v10, %v397_v9  ;;  %v400_v14 = vld [vmem:[#allocation7 + $0x18] sm:$0xff]  ;;  %1648 = vmatprep.mubr.msk.f32.mxu0 %vm2031_vm1, %v2032_v15  ;;  %1651 = vmatprep.subr.mxu1 %v2032_v15  ;;  %v1586_v21 = vld [vmem:[%s2461_s2] ss:$0 sm:$0xff]  ;;  %s2034_s15 = smov 96   ;;  %vm497_vm2 = vcmask 64512   ;;  %v2326_v33 = vshrl.u32 %v481_v32, 7 }
  0x8e   : > { %v367_v3 = vsel %vm366_vm0, %v2291_v2, 0.0  ;;  %1653 = vmatprep.mubr.msk.f32.mxu1 %vm2031_vm1, %v2032_v15  ;;  %v1715_v16 = vpack.c.bf16 %v400_v14, %v399_v11  ;;  %v1587_v23 = vld [vmem:[%s2462_s3] ss:$0 sm:$0xff]  ;;  %v2328_v34 = vand.u32 127, %v481_v32  ;;  %s2035_s18 = smov 88   ;;  %s2036_s14 = smov 120  }
  0x8f   : > { %368 = vadd.xlane.f32.xlu0 %v367_v3  ;;  %1713 = vmatpush3.bf16.msra.mxu0 %v1712_v13  ;;  %v1588_v26 = vld [vmem:[%s2464_s5] ss:$0 sm:$0xff]  ;;  %s2037_s19 = smov 112   ;;  %s2038_s21 = smov 80   ;;  %v660_v44 = vld [vmem:[#allocation8] sm:$0xff] }
  0x90   : > { %1714 = vmatprep.subr.bf16.mxu0 %v2030_v12  ;;  %vm485_vm3 = vcmp.le.s32.totalorder %v2328_v34, %v2326_v33  ;;  %s2039_s11 = smov 48   ;;  %s2040_s13 = smov 72  }
  0x91   : > { %s2041_s16 = smov 104   ;;  %s2042_s22 = smov 56  }
  0x92   : > { %s2043_s17 = smov 40  }
  0x93   : > { %1716 = vmatpush3.bf16.msra.mxu0 %v1715_v16  ;;  %v901_v16 = vld [vmem:[#allocation8 + $0x8] sm:$0xff] }
  0x94   : > { %1671 = vmatprep.subr.mxu0 %v2032_v15 }
 0x11c   : > { %v369_v4 = vpop.xlane.xlu0 %368 }
 0x11d   : > { %v371_v5 = vmul.f32 0.03125, %v369_v4 }
 0x11f   : > { %v372_v6 = vsub.f32 %v2291_v2, %v371_v5 }
 0x121   : > { %v373_v7 = vmul.f32 %v372_v6, %v372_v6 }
 0x123   : > { %v374_v8 = vsel %vm366_vm0, %v373_v7, 0.0 }
 0x124   : > { %375 = vadd.xlane.f32.xlu0 %v374_v8 }
 0x1b1   : > { %v376_v17 = vpop.xlane.xlu0 %375 }
 0x1b2   : > { %v377_v18 = vmul.f32 0.03125, %v376_v17 }
 0x1b4   : > { %v378_v19 = vadd.f32 1e-05, %v377_v18 }
 0x1b6   : > { %1816 = vrsqrt.f32 %v378_v19 }
 0x1c0   : > { %v1817_v20 = vpop.eup %1816 }
 0x1c1   : > { %v380_v22 = vmul.f32 %v1817_v20, %v372_v6 }
 0x1c3   : > { %v388_v24 = vmul.f32 %v1586_v21, %v380_v22 }
 0x1c5   : > { %v396_v25 = vadd.f32 %v1587_v23, %v388_v24  ;;  %v1142_v23 = vld [vmem:[#allocation8 + $0x10] sm:$0xff] }
 0x1c7   : > { %1649 = vmatmul.mubr.msk.f32.vlgmr.msra.gmra.mrb[0].mxu0 %vm366_vm0, %v396_v25 }
 0x1c8   : > { %1673 = vmatprep.mubr.msk.f32.mxu0 %vm2031_vm1, %v2032_v15 }
 0x29a   : > { %v477_v27 = vpop.f32.mrb[0].mxu0 }
 0x29b   : > { %v2315_v28 = vadd.f32 %v1588_v26, %v477_v27  ;;  %v1650_v29 = vpop.f32.mrb[1].mxu0 }
 0x29d   : > { %583 = vrot.lane.b32.xlu0 %v2315_v28, %s2033_s10  ;;  %495 = vrot.lane.b32.xlu1 %v2315_v28, %s2034_s15  ;;  %s1608_s15 = sshll.u32 %s2111_s9, 7  ;;  %s1460_s9 = scalar_lea.sflag [#allocation4], %s2273_s26 }
 0x30f   : > { %v496_v30 = vpop.permute.xlu1 %495  ;;  %v584_v31 = vpop.permute.xlu0 %583 }
 0x310   : > { %1652 = vmatpush3.xpose.msk.msra.mxu1 %vm497_vm2, %v496_v30 }
 0x311   : > { %1656 = vmatprep.subr.mxu1 %v2032_v15 }
 0x313   : > { %1654 = vmatmul.mubr.msk.f32.vlgmr.msra.gmra.mrb[0].mxu1 %vm497_vm2, %v2315_v28 }
 0x314   : > { %1657 = vmatpush3.msra.mxu1 %v584_v31  ;;  %1658 = vmatprep.mubr.msk.f32.mxu1 %vm2031_vm1, %v2032_v15 }
 0x315   : > { %1661 = vmatprep.subr.mxu1 %v2032_v15 }
 0x3e6   : > { %v568_v35 = vpop.f32.mrb[0].mxu1 }
 0x3e7   : > { %v572_v36 = vsel %vm485_vm3, %v568_v35, -1e+30  ;;  %v1655_v37 = vpop.f32.mrb[1].mxu1 }
 0x3e8   : > { %v573_v38 = vsel %vm497_vm2, %v572_v36, -inf }
 0x3e9   : > { %574 = vmax.xlane.f32.xlu1 %v573_v38 }
 0x3fa   : > { %737 = vrot.lane.b32.xlu1 %v2315_v28, %s2035_s18  ;;  %s362_s18 = scalar_lea.vmem [#allocation10], %s1581_s20 }
 0x3fe   : > { %735 = vrot.lane.b32.xlu1 %v2315_v28, %s2036_s14  ;;  %s1473_s14 = sshll.u32 %s362_s18, 4  ;;  %s2416_s14 = int_to_ptr.vmem [resolvable:$true] %s1473_s14 }
 0x3ff   : > { %s1948_s20 = scalar_lea.vmem %s2416_s14, 128 }
 0x400   : > { %p1949_p1 = scmp.ne.s32.totalorder %s2416_s14, %s1948_s20 }
 0x402   : > { %976 = vrot.lane.b32.xlu1 %v2315_v28, %s2037_s19  ;;  %p1950_p4 = pnand %p1949_p1, %p2228_p6 }
 0x404   : > { %p1951_p8 = pneg %p1950_p4 }
 0x476   : > { %v575_v39 = vpop.xlane.xlu1 %574 }
 0x477   : > { %v576_v40 = vsub.f32 %v572_v36, %v575_v39 }
 0x479   : > { %v577_v41 = vmul.f32 1.442695, %v576_v40 }
 0x47a   : > { %v738_v46 = vpop.permute.xlu1 %737 }
 0x47b   : > { %1818 = vpow2.f32 %v577_v41 }
 0x47e   : > { %v736_v51 = vpop.permute.xlu1 %735 }
 0x482   : > { %v977_v53 = vpop.permute.xlu1 %976 }
 0x485   : > { %v1819_v42 = vpop.eup %1818 }
 0x486   : > { %1659 = vmatmul.mubr.msk.f32.vlgmr.msra.gmra.mrb[2].mxu1 %vm497_vm2, %v1819_v42  ;;  %v579_v43 = vsel %vm497_vm2, %v1819_v42, 0.0 }
 0x487   : > { %580 = vadd.xlane.f32.xlu0 %v579_v43  ;;  %1663 = vmatprep.mubr.msk.f32.mxu1 %vm2031_vm1, %v2032_v15 }
 0x488   : > { %1662 = vmatpush3.msra.mxu1 %v660_v44  ;;  %v1590_v44 = vld [vmem:[%s2466_s7] ss:$0 sm:$0xff] }
 0x489   : > { %1666 = vmatprep.subr.mxu1 %v2032_v15 }
 0x49d   : > { %978 = vrot.lane.b32.xlu0 %v2315_v28, %s2038_s21 }
 0x4a1   : > { %1065 = vrot.lane.b32.xlu0 %v2315_v28, %s2039_s11  ;;  %s2414_s11 = scalar_lea.hbm %s2467_s8, %s1608_s15 }
 0x4a5   : > { %1219 = vrot.lane.b32.xlu0 %v2315_v28, %s2040_s13  ;;  %s2044_s13 = smov [#allocation10]  }
 0x4a9   : > { %1217 = vrot.lane.b32.xlu0 %v2315_v28, %s2041_s16  ;;  %s1952_s16 = sshll.u32 %s2044_s13, 4  ;;  %s1953_s16 = int_to_ptr.vmem [resolvable:$false] %s1952_s16 }
 0x4aa   : > { %p1955_p3 = scmp.lt.s32.totalorder %s2416_s14, %s1953_s16 }
 0x514   : > { %v581_v45 = vpop.xlane.xlu0 %580 }
 0x515   : > { %1820 = vrcp.f32 %v581_v45  ;;  %v493_v45 = vadd.f32 %v1590_v44, %v2291_v2 }
 0x518   : > { %v979_v52 = vpop.permute.xlu0 %978 }
 0x51c   : > { %v1066_v54 = vpop.permute.xlu0 %1065 }
 0x51f   : > { %v1821_v47 = vpop.eup %1820 }
 0x520   : > { %v1220_v1 = vpop.permute.xlu0 %1219 }
 0x524   : > { %v1218_v3 = vpop.permute.xlu0 %1217 }
 0x559   : > { %v655_v48 = vpop.f32.mrb[2].mxu1 }
 0x55a   : > { %v659_v49 = vmul.f32 %v1821_v47, %v655_v48  ;;  %v1660_v50 = vpop.f32.mrb[3].mxu1 }
 0x55c   : > { %1664 = vmatmul.mubr.msk.f32.vlgmr.msra.gmra.mrb[4].mxu1 %vm497_vm2, %v659_v49 }
 0x55d   : > { %1667 = vmatpush3.xpose.msk.msra.mxu1 %vm497_vm2, %v738_v46  ;;  %1668 = vmatprep.mubr.msk.f32.mxu1 %vm2031_vm1, %v2032_v15 }
 0x55e   : > { %1681 = vmatprep.subr.mxu1 %v2032_v15 }
 0x560   : > { %1669 = vmatmul.mubr.msk.f32.vlgmr.msra.gmra.mrb[6].mxu1 %vm497_vm2, %v736_v51 }
 0x561   : > { %1682 = vmatpush3.xpose.msk.msra.mxu1 %vm497_vm2, %v979_v52  ;;  %1683 = vmatprep.mubr.msk.f32.mxu1 %vm2031_vm1, %v2032_v15 }
 0x562   : > { %1686 = vmatprep.subr.mxu1 %v2032_v15 }
 0x564   : > { %1684 = vmatmul.mubr.msk.f32.vlgmr.msra.gmra.mrb[8].mxu1 %vm497_vm2, %v977_v53 }
 0x565   : > { %1687 = vmatpush3.msra.mxu1 %v1066_v54  ;;  %1688 = vmatprep.mubr.msk.f32.mxu1 %vm2031_vm1, %v2032_v15 }
 0x566   : > { %1696 = vmatprep.subr.mxu1 %v2032_v15 }
 0x62f   : > { %v2362_v55 = vpop.f32.mrb[4].mxu1 }
 0x630   : > { %v1665_v56 = vpop.f32.mrb[5].mxu1 }
 0x633   : > { %v809_v57 = vpop.f32.mrb[6].mxu1 }
 0x634   : > { %v813_v58 = vsel %vm485_vm3, %v809_v57, -1e+30  ;;  %v1670_v59 = vpop.f32.mrb[7].mxu1 }
 0x635   : > { %v814_v60 = vsel %vm497_vm2, %v813_v58, -inf }
 0x636   : > { %815 = vmax.xlane.f32.xlu0 %v814_v60 }
 0x637   : > { %v1050_v61 = vpop.f32.mrb[8].mxu1 }
 0x638   : > { %v1054_v62 = vsel %vm485_vm3, %v1050_v61, -1e+30  ;;  %v1685_v63 = vpop.f32.mrb[9].mxu1 }
 0x639   : > { %v1055_v0 = vsel %vm497_vm2, %v1054_v62, -inf }
 0x63a   : > { %1056 = vmax.xlane.f32.xlu1 %v1055_v0 }
 0x64b   : > { %824 = vrot.lane.b32.xlu1 %v2315_v28, %s2042_s22  ;;  %s1954_s22 = scalar_lea.vmem %s1953_s16, 256 }
 0x64c   : > { %p1956_p7 = scmp.lt.s32.totalorder %s1954_s22, %s1948_s20 }
 0x64e   : > { %p1957_p10 = por %p1956_p7, %p1955_p3 }
 0x650   : > { %p1958_p13 = pnand %p1957_p10, %p1951_p8 }
 0x6c3   : > { %v816_v4 = vpop.xlane.xlu0 %815 }
 0x6c4   : > { %v817_v5 = vsub.f32 %v813_v58, %v816_v4 }
 0x6c6   : > { %v818_v6 = vmul.f32 1.442695, %v817_v5 }
 0x6c7   : > { %v1057_v7 = vpop.xlane.xlu1 %1056 }
 0x6c8   : > { %1822 = vpow2.f32 %v818_v6  ;;  %v1058_v8 = vsub.f32 %v1054_v62, %v1057_v7 }
 0x6ca   : > { %v1059_v9 = vmul.f32 1.442695, %v1058_v8 }
 0x6cb   : > { %v825_v10 = vpop.permute.xlu1 %824 }
 0x6cc   : > { %1824 = vpow2.f32 %v1059_v9  ;;  %1672 = vmatpush3.msra.mxu0 %v825_v10 }
 0x6cd   : > { %1676 = vmatprep.subr.mxu0 %v2032_v15 }
 0x6d2   : > { %v1823_v11 = vpop.eup %1822 }
 0x6d3   : > { %1674 = vmatmul.mubr.msk.f32.vlgmr.msra.gmra.mrb[2].mxu0 %vm497_vm2, %v1823_v11  ;;  %v820_v12 = vsel %vm497_vm2, %v1823_v11, 0.0 }
 0x6d4   : > { %821 = vadd.xlane.f32.xlu1 %v820_v12  ;;  %1678 = vmatprep.mubr.msk.f32.mxu0 %vm2031_vm1, %v2032_v15 }
 0x6d5   : > { %1677 = vmatpush3.msra.mxu0 %v901_v16 }
 0x6d6   : > { %v1825_v13 = vpop.eup %1824  ;;  %1691 = vmatprep.subr.mxu0 %v2032_v15 }
 0x6d7   : > { %1689 = vmatmul.mubr.msk.f32.vlgmr.msra.gmra.mrb[10].mxu1 %vm497_vm2, %v1825_v13  ;;  %v1061_v14 = vsel %vm497_vm2, %v1825_v13, 0.0 }
 0x6d8   : > { %1697 = vmatpush3.xpose.msk.msra.mxu1 %vm497_vm2, %v1220_v1  ;;  %1062 = vadd.xlane.f32.xlu0 %v1061_v14 }
 0x6d9   : > { %1698 = vmatprep.mubr.msk.f32.mxu1 %vm2031_vm1, %v2032_v15 }
 0x6db   : > { %1699 = vmatmul.mubr.msk.f32.vlgmr.msra.gmra.mrb[12].mxu1 %vm497_vm2, %v1218_v3 }
 0x761   : > { %v822_v17 = vpop.xlane.xlu1 %821 }
 0x762   : > { %1826 = vrcp.f32 %v822_v17 }
 0x765   : > { %v1063_v18 = vpop.xlane.xlu0 %1062 }
 0x766   : > { %1828 = vrcp.f32 %v1063_v18 }
 0x76c   : > { %v1827_v19 = vpop.eup %1826 }
 0x770   : > { %v1829_v26 = vpop.eup %1828 }
 0x7a6   : > { %v896_v20 = vpop.f32.mrb[2].mxu0 }
 0x7a7   : > { %v900_v21 = vmul.f32 %v1827_v19, %v896_v20  ;;  %v1675_v22 = vpop.f32.mrb[3].mxu0 }
 0x7a9   : > { %1679 = vmatmul.mubr.msk.f32.vlgmr.msra.gmra.mrb[4].mxu0 %vm497_vm2, %v900_v21 }
 0x7aa   : > { %v1137_v24 = vpop.f32.mrb[10].mxu1  ;;  %1692 = vmatpush3.msra.mxu0 %v1142_v23  ;;  %1693 = vmatprep.mubr.msk.f32.mxu0 %vm2031_vm1, %v2032_v15 }
 0x7ab   : > { %v1690_v25 = vpop.f32.mrb[11].mxu1  ;;  %1701 = vmatprep.subr.mxu0 %v2032_v15  ;;  %v1141_v29 = vmul.f32 %v1829_v26, %v1137_v24 }
 0x7ae   : > { %v1291_v27 = vpop.f32.mrb[12].mxu1 }
 0x7af   : > { %v1295_v30 = vsel %vm485_vm3, %v1291_v27, -1e+30  ;;  %v1700_v31 = vpop.f32.mrb[13].mxu1 }
 0x7b0   : > { %v1296_v32 = vsel %vm497_vm2, %v1295_v30, -inf }
 0x7b1   : > { %1297 = vmax.xlane.f32.xlu0 %v1296_v32  ;;  %1694 = vmatmul.mubr.msk.f32.vlgmr.msra.gmra.mrb[4].mxu0 %vm497_vm2, %v1141_v29 }
 0x7b2   : > { %1703 = vmatprep.mubr.msk.f32.mxu0 %vm2031_vm1, %v2032_v15 }
 0x7c7   : > { %1306 = vrot.lane.b32.xlu0 %v2315_v28, %s2043_s17  ;;  %v1383_v28 = vld [vmem:[#allocation8 + $0x18] sm:$0xff] }
 0x83e   : > { %v1298_v35 = vpop.xlane.xlu0 %1297 }
 0x83f   : > { %v1299_v36 = vsub.f32 %v1295_v30, %v1298_v35 }
 0x841   : > { %v1300_v37 = vmul.f32 1.442695, %v1299_v36 }
 0x842   : > { %v1307_v38 = vpop.permute.xlu0 %1306 }
 0x843   : > { %1830 = vpow2.f32 %v1300_v37  ;;  %1702 = vmatpush3.msra.mxu0 %v1307_v38 }
 0x844   : > { %1706 = vmatprep.subr.mxu0 %v2032_v15 }
 0x84d   : > { %v1831_v33 = vpop.eup %1830 }
 0x84e   : > { %1704 = vmatmul.mubr.msk.f32.vlgmr.msra.gmra.mrb[6].mxu0 %vm497_vm2, %v1831_v33  ;;  %v1302_v34 = vsel %vm497_vm2, %v1831_v33, 0.0 }
 0x84f   : > { %1303 = vadd.xlane.f32.xlu1 %v1302_v34  ;;  %1708 = vmatprep.mubr.msk.f32.mxu0 %vm2031_vm1, %v2032_v15  ;;  %v734_v15 = vadd.f32 %v2362_v55, %v493_v45 }
 0x850   : > { %1707 = vmatpush3.msra.mxu0 %v1383_v28 }
 0x8dc   : > { %v1304_v39 = vpop.xlane.xlu1 %1303 }
 0x8dd   : > { %1832 = vrcp.f32 %v1304_v39 }
 0x8e7   : > { %v1833_v40 = vpop.eup %1832 }
 0x921   : > { %v1378_v41 = vpop.f32.mrb[6].mxu0 }
 0x922   : > { %v1382_v42 = vmul.f32 %v1833_v40, %v1378_v41  ;;  %v1705_v43 = vpop.f32.mrb[7].mxu0 }
 0x924   : > { %1709 = vmatmul.mubr.msk.f32.vlgmr.msra.gmra.mrb[4].mxu0 %vm497_vm2, %v1382_v42 }
 0x9f7   : > { %v1453_v46 = vpop.f32.mrb[4].mxu0 }
 0x9f8   : > { %v1718_v47 = vadd.f32 %v1453_v46, %v734_v15  ;;  %v1710_v48 = vpop.f32.mrb[5].mxu0 }
 0x9fa   : > { %1458 = vst.msk [vmem:[%s362_s18] sm:$0xff] %vm366_vm0, %v1718_v47 }
 0x9fb   : > { %1961 = shalt.err (!%p1958_p13)
}
 0x9fc   : > { %s1962_s26 = scalar_lea.hbm %s2414_s11, 128  ;;  %s1966_s10 = scalar_lea.hbm %s2467_s8, 256 }
 0x9fd   : > { %p1963_p5 = scmp.ne.s32.totalorder %s2414_s11, %s1962_s26  ;;  %p1967_p9 = scmp.lt.u32.totalorder %s2414_s11, %s2467_s8 }
 0x9fe   : > { %p1968_p12 = scmp.lt.u32.totalorder %s1966_s10, %s1962_s26  ;;  %p1970_p1 = scmp.lt.u32.totalorder %s1962_s26, %s2414_s11 }
 0x9ff   : > { %p1964_p0 = pnand %p1963_p5, %p2228_p6 }
 0xa00   : > { %p1969_p2 = por %p1968_p12, %p1967_p9 }
 0xa01   : > { %p1965_p11 = pneg %p1964_p0 }
 0xa02   : > { %p1971_p4 = por %p1970_p1, %p1969_p2 }
 0xa04   : > { %p1972_p8 = pnand %p1971_p4, %p1965_p11 }
 0xa06   : > { %1975 = shalt.err (!%p1972_p8)
}
 0xa07   : > { %1737 = dma.vmem_to_hbm [thread:$0]  (%p2228_p6), %s2416_s14, 128, %s2414_s11, %s1460_s9  }
 0xa08 PF: > { %s1485_s19 = sand.u32 1, %s2010_s27   ;;  %p2487_p3 = scmp.ne.s32.totalorder %s2473_s12, 0 }
 0xa09   : > { %p2488_p7 = scmp.ge.s32.totalorder %s2022_s30, 2  ;;  %s1486_s21 = scalar_lea.sflag [#allocation4], %s1485_s19 }
 0xa0b   : > { %p1754_p10 = pnand %p2488_p7, %p2487_p3 }
 0xa0d   : > { %2005 = dma.done.wait (!%p1754_p10), %s1486_s21, 128  }
 0xa0e   : > { %2007 = vsyncadd (!%p1754_p10), %s1486_s21, 4294967168  ;;  %p23_p13 = scmp.ge.s32.totalorder %s2214_s1, 4   ;;  %s2489_s27 = smov %s2014_s28 }
 0xa0f   : > { %s2490_s28 = smov %s2018_s29  ;;  %s2491_s29 = smov %s2224_s24 }
 0xa10   : > { %s2492_s30 = smov %s2214_s1  ;;  %25 = sbr.rel (!%p23_p13) target bundleno = 9 (0x9), region = 109 }
 0xa17   :  { %1491 = vsyncpa [#allocation3], 1 }
 0xa18   :  { %1493 = vsyncpa [#allocation3 + $0x1], 1 }
 0xa19   :  { %1494 = vsyncpa [#allocation6], 1 }
 0xa1a   :  { %1495 = vsyncpa [#allocation9], 1 }
 0xa1b   :  { %1496 = vsyncpa [#allocation4], 1 }
 0xa1c   :  { %1498 = vsyncpa [#allocation4 + $0x1], 1 }

</bundles_post_ra>
